<compile_context>
chip_gen: v7x
topology: tpu7x:2x2x1
jax: 0.10.0
libtpu: 0.0.40
codegen_flags: <defaults>
</compile_context>

<pallas_src>
import functools
import math

import jax
import jax.numpy as jnp
from jax.experimental import pallas as pl
from jax.experimental.pallas import tpu as pltpu


def _se_kernel(params_ref, x_ref, o_ref, *, C, Ch, inv_hw, add_residual):
    """One batch tile of the SE forward.

    params_ref : (Ch + C + 2, max(C, Ch)) f32, packed [fc1_w; fc2_w; fc1_b; fc2_b].
    x_ref      : (bt, C, HW) input tile (all channels, full spatial extent).
    o_ref      : (bt, C, HW) output tile.
    """
    # ---- Squeeze: padding-free global average pool over the lane-mapped
    # spatial axis.  The f32 upcast fuses into the lane reduce.
    pooled = jnp.sum(x_ref[...], axis=-1, dtype=jnp.float32) * inv_hw      # (bt, C)

    # ---- Excitation: tiny FC1/FC2 in f32, kept off the MXU (VPU mul + lane
    # reduce).  Weights/biases come from one packed resident operand.
    p = params_ref[...].astype(jnp.float32)
    w1 = p[0:Ch, 0:C]                        # (Ch, C)  fc1 weight (out, in)
    w2 = p[Ch:Ch + C, 0:Ch]                  # (C, Ch)  fc2 weight (out, in)
    b1 = p[Ch + C:Ch + C + 1, 0:Ch]          # (1, Ch)  fc1 bias
    b2 = p[Ch + C + 1:Ch + C + 2, 0:C]       # (1, C)   fc2 bias

    h = jnp.sum(pooled[:, None, :] * w1[None, :, :], axis=-1) + b1         # (bt, Ch)
    h = jnp.maximum(h, 0.0)
    y = jnp.sum(h[:, None, :] * w2[None, :, :], axis=-1) + b2              # (bt, C)
    y = jax.nn.sigmoid(y)                                                  # f32 gate

    # ---- Scale (+ fused residual).  Re-read x_ref rather than keeping a copy
    # live across the gate math; multiply with the f32 gate, cast only at the
    # final store.
    x = x_ref[...].astype(jnp.float32)
    out = x * y[:, :, None]
    if add_residual:
        out = out + x
    o_ref[...] = out.astype(o_ref.dtype)


def _pick_batch_tile(B, C, HW, itemsize):
    """Pick the per-step batch tile so each x/out block is ~0.5-4 MiB of VMEM."""
    # VMEM footprint of one sample's (C, HW) slab including layout padding
    # (sublane tile of 8/16/32 rows, lane tile of 128).
    sub = {4: 8, 2: 16, 1: 32}.get(itemsize, 8)
    c_pad = -(-C // sub) * sub
    hw_pad = -(-HW // 128) * 128
    per_sample = c_pad * hw_pad * itemsize

    target = 2 * 1024 * 1024      # ~2 MiB blocks amortize the ~0.35 us/step
    max_block = 4 * 1024 * 1024   # grid overhead; 4x this (double-buffered
                                  # in + out) stays well under v7x's 64 MiB VMEM.
    bt = max(1, min(B, target // max(1, per_sample)))
    bt = max(1, min(bt, max(1, max_block // max(1, per_sample))))
    if B >= 2:
        # Keep >= 2 grid steps so dimension_semantics=("parallel",) can shard
        # the batch across both v7x TensorCores.
        bt = min(bt, -(-B // 2))
    return bt, per_sample


def channel_se_layer(x, fc1_w, fc1_b, fc2_w, fc2_b, add_residual=False):
    """Forward pass of ChannelSELayer.

    x      : (B, C, spatial...)  float32 or bfloat16.
    fc1_w  : (C // r, C)   fc1 weight, PyTorch nn.Linear (out, in) layout.
    fc1_b  : (C // r,)
    fc2_w  : (C, C // r)   fc2 weight, PyTorch nn.Linear (out, in) layout.
    fc2_b  : (C,)
    """
    B, C = x.shape[:2]
    HW = int(math.prod(x.shape[2:]))
    Ch = fc1_w.shape[0]

    # Flatten spatial dims onto the lane axis -- a free reshape of contiguous
    # trailing dims.  No padding and no final slice (block dims == array dims).
    x3 = x.reshape(B, C, HW)

    # Pack the four tiny FC operands into one small resident f32 tile.
    Cm = max(C, Ch)
    packed = jnp.zeros((Ch + C + 2, Cm), jnp.float32)
    packed = packed.at[0:Ch, 0:C].set(fc1_w.astype(jnp.float32))
    packed = packed.at[Ch:Ch + C, 0:Ch].set(fc2_w.astype(jnp.float32))
    packed = packed.at[Ch + C, 0:Ch].set(fc1_b.astype(jnp.float32))
    packed = packed.at[Ch + C + 1, 0:C].set(fc2_b.astype(jnp.float32))

    bt, per_sample = _pick_batch_tile(B, C, HW, x.dtype.itemsize)
    grid = (pl.cdiv(B, bt),)   # tail block (if any) handled by masked stores

    # VMEM budget: double-buffered input + output blocks + params + headroom.
    block_bytes = bt * per_sample
    needed = 4 * block_bytes + packed.size * 4 + 2 * 1024 * 1024
    vmem_limit = int(min(max(32 * 1024 * 1024, needed), 112 * 1024 * 1024))

    kernel = functools.partial(
        _se_kernel, C=C, Ch=Ch, inv_hw=1.0 / float(HW),
        add_residual=bool(add_residual))

    grid_spec = pltpu.PrefetchScalarGridSpec(
        num_scalar_prefetch=0,
        grid=grid,
        in_specs=[
            pl.BlockSpec((Ch + C + 2, Cm), lambda i: (0, 0)),   # packed params (resident)
            pl.BlockSpec((bt, C, HW), lambda i: (i, 0, 0)),     # x tile
        ],
        out_specs=pl.BlockSpec((bt, C, HW), lambda i: (i, 0, 0)),
    )

    out3 = pl.pallas_call(
        kernel,
        out_shape=jax.ShapeDtypeStruct((B, C, HW), x.dtype),
        grid_spec=grid_spec,
        compiler_params=pltpu.CompilerParams(
            dimension_semantics=("parallel",),   # batch axis: megacore on v7x
            vmem_limit_bytes=vmem_limit,
        ),
    )(packed, x3)

    return out3.reshape(x.shape)


def _reference(x, fc1_w, fc1_b, fc2_w, fc2_b, add_residual=False):
    """Pure-JAX reference of the PyTorch forward."""
    pooled = jnp.mean(x, axis=tuple(range(2, x.ndim)))            # (B, C)
    h = jnp.maximum(pooled @ fc1_w.T + fc1_b, 0.0)                # fc1 + relu
    y = jax.nn.sigmoid(h @ fc2_w.T + fc2_b)                       # fc2 + sigmoid
    gate = y.reshape(y.shape + (1,) * (x.ndim - 2))
    out = x * gate
    if add_residual:
        out = out + x
    return out


if __name__ == "__main__":
    # Module config: spatial_dims=2, in_channels=4, r=2 -> hidden channels = 2.
    B, C, H, W = 2, 4, 16, 16
    r = 2
    Ch = C // r

    key = jax.random.PRNGKey(0)
    kx, k1, k2, k3, k4 = jax.random.split(key, 5)

    x = jax.random.normal(kx, (B, C, H, W), dtype=jnp.float32)

    # PyTorch nn.Linear layout: weight is (out_features, in_features).
    fc1_w = jax.random.normal(k1, (Ch, C), dtype=jnp.float32) * 0.5
    fc1_b = jax.random.normal(k2, (Ch,), dtype=jnp.float32) * 0.1
    fc2_w = jax.random.normal(k3, (C, Ch), dtype=jnp.float32) * 0.5
    fc2_b = jax.random.normal(k4, (C,), dtype=jnp.float32) * 0.1

    # Plain SE forward.
    out = channel_se_layer(x, fc1_w, fc1_b, fc2_w, fc2_b, add_residual=False)
    out = jax.block_until_ready(out)
    ref = _reference(x, fc1_w, fc1_b, fc2_w, fc2_b, add_residual=False)
    assert out.shape == (B, C, H, W)
    assert jnp.allclose(out, ref, atol=1e-5, rtol=1e-5), "mismatch (no residual)"

    # Residual variant (fused in-kernel).
    out_res = channel_se_layer(x, fc1_w, fc1_b, fc2_w, fc2_b, add_residual=True)
    out_res = jax.block_until_ready(out_res)
    ref_res = _reference(x, fc1_w, fc1_b, fc2_w, fc2_b, add_residual=True)
    assert jnp.allclose(out_res, ref_res, atol=1e-5, rtol=1e-5), "mismatch (residual)"

    print("KERNEL_OK")
</pallas_src>

<mosaic_0001>
module attributes {stable_mosaic.version = 11 : i64} {
  func.func @_se_kernel(%arg0: i32, %arg1: memref<8x4xf32, #tpu.memory_space<vmem>>, %arg2: memref<1x4x256xf32, #tpu.memory_space<vmem>>, %arg3: memref<1x4x256xf32, #tpu.memory_space<vmem>>) attributes {dimension_semantics = [#tpu.dimension_semantics<parallel>], iteration_bounds = array<i64: 2>, scalar_prefetch = 0 : i64, scratch_operands = 0 : i64, tpu.core_type = #tpu.core_type<tc>, window_params = [{pipeline_mode = #tpu.pipeline_mode<synchronous>, transform_indices = @transform_0, window_bounds = array<i64: 8, 4>}, {transform_indices = @transform_1, window_bounds = array<i64: 1, 4, 256>}, {transform_indices = @transform_2, window_bounds = array<i64: 1, 4, 256>}]} {
    %c0 = arith.constant 0 : index
    %c0_0 = arith.constant 0 : index
    %c0_1 = arith.constant 0 : index
    %0 = vector.load %arg2[%c0, %c0_0, %c0_1] : memref<1x4x256xf32, #tpu.memory_space<vmem>>, vector<1x4x256xf32>
    %cst = arith.constant dense<0.000000e+00> : vector<1x4xf32>
    %1 = vector.multi_reduction <add>, %0, %cst [2] : vector<1x4x256xf32> to vector<1x4xf32>
    %cst_2 = arith.constant 3.906250e-03 : f32
    %2 = vector.broadcast %cst_2 : f32 to vector<1x4xf32>
    %3 = arith.mulf %1, %2 : vector<1x4xf32>
    %c0_3 = arith.constant 0 : index
    %c0_4 = arith.constant 0 : index
    %4 = vector.load %arg1[%c0_3, %c0_4] : memref<8x4xf32, #tpu.memory_space<vmem>>, vector<8x4xf32>
    %5 = vector.extract_strided_slice %4 {offsets = [0, 0], sizes = [2, 4], strides = [1, 1]} : vector<8x4xf32> to vector<2x4xf32>
    %6 = vector.extract_strided_slice %4 {offsets = [2, 0], sizes = [4, 2], strides = [1, 1]} : vector<8x4xf32> to vector<4x2xf32>
    %7 = vector.extract_strided_slice %4 {offsets = [6, 0], sizes = [1, 2], strides = [1, 1]} : vector<8x4xf32> to vector<1x2xf32>
    %8 = vector.extract_strided_slice %4 {offsets = [7, 0], sizes = [1, 4], strides = [1, 1]} : vector<8x4xf32> to vector<1x4xf32>
    %9 = vector.shape_cast %3 : vector<1x4xf32> to vector<1x1x4xf32>
    %10 = vector.shape_cast %5 : vector<2x4xf32> to vector<1x2x4xf32>
    %11 = vector.broadcast %9 : vector<1x1x4xf32> to vector<1x2x4xf32>
    %12 = arith.mulf %11, %10 : vector<1x2x4xf32>
    %cst_5 = arith.constant dense<0.000000e+00> : vector<1x2xf32>
    %13 = vector.multi_reduction <add>, %12, %cst_5 [2] : vector<1x2x4xf32> to vector<1x2xf32>
    %14 = arith.addf %13, %7 : vector<1x2xf32>
    %cst_6 = arith.constant 0.000000e+00 : f32
    %15 = vector.broadcast %cst_6 : f32 to vector<1x2xf32>
    %16 = arith.maximumf %14, %15 : vector<1x2xf32>
    %17 = vector.shape_cast %16 : vector<1x2xf32> to vector<1x1x2xf32>
    %18 = vector.shape_cast %6 : vector<4x2xf32> to vector<1x4x2xf32>
    %19 = vector.broadcast %17 : vector<1x1x2xf32> to vector<1x4x2xf32>
    %20 = arith.mulf %19, %18 : vector<1x4x2xf32>
    %cst_7 = arith.constant dense<0.000000e+00> : vector<1x4xf32>
    %21 = vector.multi_reduction <add>, %20, %cst_7 [2] : vector<1x4x2xf32> to vector<1x4xf32>
    %22 = arith.addf %21, %8 : vector<1x4xf32>
    %23 = arith.negf %22 : vector<1x4xf32>
    %24 = math.exp %23 : vector<1x4xf32>
    %cst_8 = arith.constant 1.000000e+00 : f32
    %25 = vector.broadcast %cst_8 : f32 to vector<1x4xf32>
    %26 = arith.addf %25, %24 : vector<1x4xf32>
    %27 = arith.divf %25, %26 : vector<1x4xf32>
    %c0_9 = arith.constant 0 : index
    %c0_10 = arith.constant 0 : index
    %c0_11 = arith.constant 0 : index
    %28 = vector.load %arg2[%c0_9, %c0_10, %c0_11] : memref<1x4x256xf32, #tpu.memory_space<vmem>>, vector<1x4x256xf32>
    %29 = vector.shape_cast %27 : vector<1x4xf32> to vector<1x4x1xf32>
    %30 = vector.broadcast %29 : vector<1x4x1xf32> to vector<1x4x256xf32>
    %31 = arith.mulf %28, %30 : vector<1x4x256xf32>
    %c0_12 = arith.constant 0 : index
    %c0_13 = arith.constant 0 : index
    %c0_14 = arith.constant 0 : index
    %32 = vector.load %arg3[%c0_12, %c0_13, %c0_14] : memref<1x4x256xf32, #tpu.memory_space<vmem>>, vector<1x4x256xf32>
    tpu.vector_store %arg3[%c0_12, %c0_13, %c0_14], %31 {strides = array<i32>} : memref<1x4x256xf32, #tpu.memory_space<vmem>>, vector<1x4x256xf32>,
    return
  }
  func.func @transform_0(%arg0: i32) -> (i32, i32) {
    %c0_i32 = arith.constant 0 : i32
    %c0_i32_0 = arith.constant 0 : i32
    %c0_i32_1 = arith.constant 0 : i32
    return %c0_i32, %c0_i32_0 : i32, i32
  }
  func.func @transform_1(%arg0: i32) -> (i32, i32, i32) {
    %c0_i32 = arith.constant 0 : i32
    %c0_i32_0 = arith.constant 0 : i32
    %c0_i32_1 = arith.constant 0 : i32
    return %arg0, %c0_i32, %c0_i32_0 : i32, i32, i32
  }
  func.func @transform_2(%arg0: i32) -> (i32, i32, i32) {
    %c0_i32 = arith.constant 0 : i32
    %c0_i32_0 = arith.constant 0 : i32
    %c0_i32_1 = arith.constant 0 : i32
    return %arg0, %c0_i32, %c0_i32_0 : i32, i32, i32
  }
}

</mosaic_0001>

<bundles_post_ra>
// kernel: tpu_custom_call.1
= control target key start
LH: loop header
LB: loop body
LE: loop exit
PB: predicated region body
PF: predicated region fallthrough
CT: control target
= control target key end

     0   :  { %7 = vsyncpa [#allocation3], 0  ;;  %s805_s0 = inlined_call_operand.vmem [shape: f32[8,4], index: 0, kind: input, shape index: {}]   ;;  %s806_s1 = inlined_call_operand.hbm [shape: f32[2,4,256], index: 1, kind: input, shape index: {}]   ;;  %s807_s2 = inlined_call_operand.hbm [shape: f32[2,4,256], index: 2, kind: output, shape index: {}]  }
   0x1   :  { %9 = vsyncpa [#allocation3 + $0x1], 0 }
   0x2   :  { %10 = vsyncpa [#allocation4], 0 }
   0x3   :  { %12 = vsyncpa [#allocation4 + $0x1], 0  ;;  %s607_s9 = smov 0   ;;  %s609_s10 = smov 0  }
   0x4   :  { %s611_s11 = smov 0   ;;  %s613_s12 = smov 0  }
   0x5 LB: > { %s628_s13 = sadd.s32 4294967295, %s586_s12   ;;  %s418_s14 = sadd.s32 4294967294, %s586_s12   ;;  %s586_s12 = sphi %s613_s12, %s822_s12   ;;  %s582_s11 = sphi %s611_s11, %s821_s11   ;;  %s578_s10 = sphi %s609_s10, %s820_s10   ;;  %s574_s9 = sphi %s607_s9, %s819_s9  }
   0x6   : > { %s632_s15 = sadd.s32 1, %s586_s12   ;;  %s46_s16 = sadd.s32 1, %s582_s11 }
   0x7   : > { %s43_s17 = ssub.s32 %s586_s12, %s632_s15  ;;  %p53_p0 = scmp.ne.s32.totalorder %s582_s11, %s578_s10 }
   0x8   : > { %p44_p1 = scmp.eq.s32.totalorder %s43_s17, 0  ;;  %p54_p2 = scmp.eq.s32.totalorder %s586_s12, 0 }
   0x9   : > { %p59_p3 = scmp.ne.s32.totalorder %s578_s10, %s574_s9  ;;  %p60_p4 = scmp.eq.s32.totalorder %s628_s13, 0 }
   0xa   : > { %s644_s18 = scalar_select %p44_p1, %s582_s11, %s46_s16  }
   0xb   : > { %p646_p5 = por %p54_p2, %p53_p0  ;;  %p650_p6 = por %p60_p4, %p59_p3 }
   0xc   : > { %p83_p7 = scmp.eq.s32.totalorder %s628_s13, 1  ;;  %p89_p8 = scmp.eq.s32.totalorder %s418_s14, 1 }
   0xd   : > { %p447_p10 = scmp.lt.s32.totalorder %s586_s12, 2  ;;  %s112_s23 = sand.u32 1, %s582_s11  }
   0xe   : > { %p657_p11 = por %p83_p7, %p53_p0  ;;  %p661_p12 = por %p89_p8, %p59_p3 }
   0xf   : > { %s433_s24 = sshll.u32 %s586_s12, 7  ;;  %s421_s25 = sshll.u32 %s112_s23, 3 }
  0x10   : > { %s811_s21 = scalar_select %p657_p11, 1, 0 }
  0x11   : > { %s812_s22 = scalar_select %p661_p12, 1, 0 }
  0x12   : > { %s670_s28 = scalar_lea.hbm %s806_s1, %s433_s24  ;;  %s116_s29 = scalar_lea.vmem [#allocation2], %s421_s25 }
  0x13   : > { %s124_s30 = sshll.u32 %s116_s29, 4  ;;  %p674_p13 = pnand %p447_p10, %p646_p5  ;;  %s678_s30 = int_to_ptr.vmem [resolvable:$true] %s124_s30 }
  0x14   : > { %s113_s4 = scalar_lea.sflag [#allocation3], %s112_s23  ;;  %s490_s5 = scalar_lea.hbm %s670_s28, 128 }
  0x15   : > { %p491_p2 = scmp.ne.s32.totalorder %s670_s28, %s490_s5  ;;  %p492_p3 = pneg %p674_p13 }
  0x16   : > { %s495_s8 = scalar_lea.hbm %s806_s1, 256  ;;  %p496_p5 = scmp.lt.u32.totalorder %s670_s28, %s806_s1 }
  0x17   : > { %p493_p4 = pnand %p492_p3, %p491_p2  ;;  %p497_p8 = scmp.lt.u32.totalorder %s495_s8, %s490_s5 }
  0x18   : > { %p499_p9 = scmp.lt.u32.totalorder %s490_s5, %s670_s28 }
  0x19   : > { %p494_p7 = pneg %p493_p4  ;;  %p498_p10 = por %p497_p8, %p496_p5 }
  0x1b   : > { %p500_p0 = por %p499_p9, %p498_p10 }
  0x1d   : > { %p501_p1 = pnand %p500_p0, %p494_p7 }
  0x1f   : > { %504 = shalt.err (!%p501_p1)
}
  0x20   : > { %s505_s17 = scalar_lea.vmem %s678_s30, 128  ;;  %s588_s19 = smov [#allocation2]  }
  0x21   : > { %p506_p2 = scmp.ne.s32.totalorder %s678_s30, %s505_s17  ;;  %s510_s23 = sshll.u32 %s588_s19, 4  ;;  %s511_s23 = int_to_ptr.vmem [resolvable:$false] %s510_s23 }
  0x22   : > { %s512_s24 = scalar_lea.vmem %s511_s23, 256  ;;  %p513_p11 = scmp.lt.s32.totalorder %s678_s30, %s511_s23 }
  0x23   : > { %p508_p4 = pnand %p506_p2, %p492_p3  ;;  %p514_p5 = scmp.lt.s32.totalorder %s512_s24, %s505_s17 }
  0x25   : > { %p509_p12 = pneg %p508_p4  ;;  %p515_p8 = por %p514_p5, %p513_p11 }
  0x27   : > { %p516_p9 = pnand %p515_p8, %p509_p12 }
  0x29   : > { %519 = shalt.err (!%p516_p9)
}
  0x2a   : > { %442 = dma.hbm_to_vmem [thread:$0]  (!%p674_p13), %s670_s28, 128, %s678_s30, %s113_s4  }
  0x2b   : > { %p814_p0 = scmp.lt.s32.totalorder %s586_s12, 3  ;;  %p815_p1 = scmp.ge.s32.totalorder %s586_s12, 1 }
  0x2d   : > { %p130_p3 = pnand %p815_p1, %p814_p0 }
  0x2e   : > { %s712_s25 = sand.u32 (!%p130_p3), 1, %s578_s10  }
  0x2f   : > { %133 = sbr.rel (%p130_p3) target bundleno = 949 (0x3b5), region = 28  ;;  %s425_s26 = sshll.u32 (!%p130_p3), %s712_s25, 3 }
  0x30   : > { %s136_s27 = scalar_lea.sflag (!%p130_p3), [#allocation3], %s712_s25  ;;  %s139_s29 = scalar_lea.vmem (!%p130_p3), [#allocation2], %s425_s26 }
  0x36   : > { %565 = dma.done.wait (%p650_p6), %s136_s27, 128  }
  0x37   : > { %567 = vsyncadd (%p650_p6), %s136_s27, 4294967168  ;;  %v173_v0 = vlaneseq  ;;  %vm164_vm0 = vcmask 1043456   ;;  %v725_v3 = vld [vmem:[%s139_s29] sm:$0xff]  ;;  %v589_v12 = vmov 0   ;;  %vm209_vm1 = vcmask 1041409   ;;  %s434_s20 = sshll.u32 %s628_s13, 7 }
  0x38   : > { %v730_v4 = vld [vmem:[%s805_s0] sm:$0xff]  ;;  %v162_v5 = vcombine.high %v725_v3, %v725_v3  ;;  %v165_v6 = vsel %vm164_vm0, %v725_v3, 0.0  ;;  %483 = vset.pattern.permute.xlu1 %v589_v12  ;;  %484 = vset.pattern.permute.xlu0 %v589_v12  ;;  %vm212_vm2 = vcmask 25600   ;;  %vm295_vm3 = vcmask 1042434   ;;  %s159_s3 = scalar_lea.vmem [#allocation5], %s425_s26  ;;  %s761_s7 = scalar_lea.hbm %s807_s2, %s434_s20 }
  0x39   : > { %v722_v1 = vshrl.u32 %v173_v0, 7  ;;  %v200_v29 = vand.u32 127, %v173_v0  ;;  %vm297_vm4 = vcmask 1043459   ;;  %vm300_vm5 = vcmask 11264   ;;  %s348_s4 = sshll.u32 %s159_s3, 4  ;;  %s334_s8 = scalar_lea.sflag [#allocation4], %s712_s25  ;;  %s763_s4 = int_to_ptr.vmem [resolvable:$true] %s348_s4 }
  0x3a   : > { %v166_v8 = vsel %vm164_vm0, %v162_v5, 0.0  ;;  %s520_s14 = scalar_lea.vmem %s763_s4, 128  ;;  %p816_p11 = scmp.ne.s32.totalorder %s811_s21, 0 }
  0x3b   : > { %v182_v2 = vsub.s32 1, %v722_v1  ;;  %v167_v9 = vadd.f32 %v166_v8, %v165_v6  ;;  %v175_v10 = vsub.s32 0, %v722_v1  ;;  %v218_v19 = vsub.s32 6, %v722_v1  ;;  %p521_p6 = scmp.ne.s32.totalorder %s763_s4, %s520_s14  ;;  %s591_s13 = smov [#allocation5]  }
  0x3c   : > { %v228_v20 = vsub.s32 2, %v722_v1  ;;  %v235_v23 = vsub.s32 3, %v722_v1  ;;  %v242_v25 = vsub.s32 4, %v722_v1  ;;  %v249_v27 = vsub.s32 5, %v722_v1  ;;  %s524_s16 = sshll.u32 %s591_s13, 4  ;;  %s525_s16 = int_to_ptr.vmem [resolvable:$false] %s524_s16 }
  0x3d   : > { %v183_v7 = vrot.slane %v730_v4, %v182_v2  ;;  %168 = vadd.xlane.f32.xlu0 %v167_v9  ;;  %v176_v11 = vrot.slane %v730_v4, %v175_v10  ;;  %v219_v21 = vrot.slane %v730_v4, %v218_v19  ;;  %v203_v31 = vsub.s32 %v200_v29, %v722_v1  ;;  %p522_p12 = pnand %p521_p6, %p816_p11  ;;  %s526_s17 = scalar_lea.vmem %s525_s16, 256 }
  0x3e   : > { %v229_v22 = vrot.slane %v730_v4, %v228_v20  ;;  %v236_v24 = vrot.slane %v730_v4, %v235_v23  ;;  %v243_v26 = vrot.slane %v730_v4, %v242_v25  ;;  %v250_v28 = vrot.slane %v730_v4, %v249_v27  ;;  %p527_p7 = scmp.lt.s32.totalorder %s763_s4, %s525_s16  ;;  %p528_p10 = scmp.lt.s32.totalorder %s526_s17, %s520_s14 }
  0x3f   : > { %185 = vbcast.lane.b32.xlu1 %v183_v7, 256  ;;  %v306_v49 = vsub.s32 7, %v722_v1  ;;  %v590_v8 = vmov 839922192   ;;  %p523_p13 = pneg %p522_p12 }
  0x40   : > { %v324_v9 = vunpack.c.l.s4 %v590_v8  ;;  %p529_p2 = por %p528_p10, %p527_p7 }
  0x41   : > { %v307_v50 = vrot.slane %v730_v4, %v306_v49 }
  0x42   : > { %v325_v10 = vunpack.c.0.s8 %v324_v9  ;;  %p530_p4 = pnand %p529_p2, %p523_p13 }
  0x53   : > { %178 = vbcast.lane.b32.xlu0 %v176_v11, 256  ;;  %v328_v11 = vsub.s32 %v325_v10, %v722_v1 }
  0x57   : > { %221 = vbcast.lane.b32.xlu0 %v219_v21, 256 }
  0x5b   : > { %231 = vbcast.lane.b32.xlu0 %v229_v22, 256 }
  0x5f   : > { %238 = vbcast.lane.b32.xlu0 %v236_v24, 256 }
  0x63   : > { %245 = vbcast.lane.b32.xlu0 %v243_v26, 256 }
  0x67   : > { %252 = vbcast.lane.b32.xlu0 %v250_v28, 256 }
  0xb1   : > { %v186_v17 = vpop.permute.xlu1 %185 }
  0xca   : > { %v169_v13 = vpop.xlane.xlu0 %168 }
  0xcb   : > { %v170_v14 = vmul.f32 0.00390625, %v169_v13 }
  0xcd   : > { %v190_v18 = vmul.f32 %v186_v17, %v170_v14 }
  0xce   : > { %v179_v15 = vpop.permute.xlu0 %178 }
  0xcf   : > { %v189_v16 = vmul.f32 %v179_v15, %v170_v14 }
  0xd1   : > { %194 = vperm.xlu1 %483, %v189_v16  }
  0xd2   : > { %v222_v37 = vpop.permute.xlu0 %221 }
  0xd5   : > { %197 = vperm.xlu1 %483, %v190_v18  }
  0xd6   : > { %v232_v38 = vpop.permute.xlu0 %231 }
  0xda   : > { %v239_v39 = vpop.permute.xlu0 %238 }
  0xde   : > { %v246_v43 = vpop.permute.xlu0 %245 }
  0xe2   : > { %v253_v47 = vpop.permute.xlu0 %252 }
 0x150   : > { %v195_v30 = vpop.permute.xlu1 %194 }
 0x151   : > { %v204_v33 = vrot.slane %v195_v30, %v203_v31 }
 0x154   : > { %v198_v32 = vpop.permute.xlu1 %197 }
 0x155   : > { %v208_v34 = vrot.slane %v198_v32, %v203_v31 }
 0x157   : > { %v210_v35 = vsel %vm209_vm1, %v208_v34, %v204_v33 }
 0x158   : > { %v213_v36 = vsel %vm212_vm2, %v210_v35, 0.0 }
 0x159   : > { %214 = vadd.xlane.f32.xlu1 %v213_v36 }
 0x1e6   : > { %v215_v40 = vpop.xlane.xlu1 %214 }
 0x1e7   : > { %v224_v41 = vadd.f32 %v222_v37, %v215_v40 }
 0x1e9   : > { %v225_v42 = vmax.f32 %v224_v41, 0.0 }
 0x1eb   : > { %v258_v44 = vmul.f32 %v232_v38, %v225_v42  ;;  %v259_v45 = vmul.f32 %v239_v39, %v225_v42  ;;  %v260_v46 = vmul.f32 %v246_v43, %v225_v42  ;;  %v261_v48 = vmul.f32 %v253_v47, %v225_v42 }
 0x1ed   : > { %267 = vperm.xlu0 %484, %v258_v44   ;;  %270 = vperm.xlu1 %483, %v259_v45  }
 0x1f1   : > { %273 = vperm.xlu0 %484, %v260_v46   ;;  %309 = vbcast.lane.b32.xlu1 %v307_v50, 256 }
 0x1f5   : > { %276 = vperm.xlu0 %484, %v261_v48  }
 0x26c   : > { %v268_v51 = vpop.permute.xlu0 %267  ;;  %v271_v52 = vpop.permute.xlu1 %270 }
 0x26d   : > { %v285_v54 = vrot.slane %v271_v52, %v203_v31  ;;  %v281_v55 = vrot.slane %v268_v51, %v203_v31 }
 0x26f   : > { %v294_v58 = vsel %vm209_vm1, %v285_v54, %v281_v55 }
 0x270   : > { %v274_v53 = vpop.permute.xlu0 %273  ;;  %v310_v63 = vpop.permute.xlu1 %309 }
 0x271   : > { %v289_v56 = vrot.slane %v274_v53, %v203_v31 }
 0x273   : > { %v296_v60 = vsel %vm295_vm3, %v289_v56, %v294_v58 }
 0x274   : > { %v277_v57 = vpop.permute.xlu0 %276 }
 0x275   : > { %v293_v59 = vrot.slane %v277_v57, %v203_v31 }
 0x277   : > { %v298_v61 = vsel %vm297_vm4, %v293_v59, %v296_v60 }
 0x278   : > { %v301_v62 = vsel %vm300_vm5, %v298_v61, 0.0 }
 0x279   : > { %302 = vadd.xlane.f32.xlu0 %v301_v62 }
 0x306   : > { %v303_v0 = vpop.xlane.xlu0 %302 }
 0x307   : > { %v312_v2 = vadd.f32 %v310_v63, %v303_v0 }
 0x309   : > { %v427_v4 = vmul.f32 -1.442695, %v312_v2 }
 0x30b   : > { %486 = vpow2.f32 %v427_v4 }
 0x315   : > { %v487_v5 = vpop.eup %486 }
 0x316   : > { %v316_v6 = vadd.f32 1.0, %v487_v5 }
 0x318   : > { %488 = vrcp.f32 %v316_v6 }
 0x322   : > { %v489_v7 = vpop.eup %488 }
 0x323   : > { %321 = vperm.xlu1 %483, %v489_v7  }
 0x3a2   : > { %v322_v12 = vpop.permute.xlu1 %321 }
 0x3a3   : > { %v329_v13 = vrot.slane %v322_v12, %v328_v11 }
 0x3a5   : > { %v331_v14 = vmul.f32 %v329_v13, %v725_v3 }
 0x3a7   : > { %332 = vst [vmem:[%s159_s3] sm:$0xff] %v331_v14 }
 0x3a8   : > { %533 = shalt.err (!%p530_p4)
}
 0x3a9   : > { %s534_s19 = scalar_lea.hbm %s761_s7, 128  ;;  %s538_s25 = scalar_lea.hbm %s807_s2, 256 }
 0x3aa   : > { %p535_p5 = scmp.ne.s32.totalorder %s761_s7, %s534_s19  ;;  %p539_p0 = scmp.lt.u32.totalorder %s761_s7, %s807_s2 }
 0x3ab   : > { %p540_p1 = scmp.lt.u32.totalorder %s538_s25, %s534_s19  ;;  %p542_p6 = scmp.lt.u32.totalorder %s534_s19, %s761_s7 }
 0x3ac   : > { %p536_p8 = pnand %p535_p5, %p816_p11 }
 0x3ad   : > { %p541_p3 = por %p540_p1, %p539_p0 }
 0x3ae   : > { %p537_p9 = pneg %p536_p8 }
 0x3af   : > { %p543_p12 = por %p542_p6, %p541_p3 }
 0x3b1   : > { %p544_p13 = pnand %p543_p12, %p537_p9 }
 0x3b3   : > { %547 = shalt.err (!%p544_p13)
}
 0x3b4   : > { %437 = dma.vmem_to_hbm [thread:$0]  (%p816_p11), %s763_s4, 128, %s761_s7, %s334_s8  }
 0x3b5 PF: > { %s360_s29 = sand.u32 1, %s574_s9   ;;  %p817_p7 = scmp.ne.s32.totalorder %s812_s22, 0 }
 0x3b6   : > { %p818_p10 = scmp.ge.s32.totalorder %s586_s12, 2  ;;  %s361_s28 = scalar_lea.sflag [#allocation4], %s360_s29 }
 0x3b8   : > { %p444_p2 = pnand %p818_p10, %p817_p7 }
 0x3ba   : > { %569 = dma.done.wait (!%p444_p2), %s361_s28, 128  }
 0x3bb   : > { %571 = vsyncadd (!%p444_p2), %s361_s28, 4294967168  ;;  %p15_p4 = scmp.ge.s32.totalorder %s632_s15, 4   ;;  %s819_s9 = smov %s578_s10 }
 0x3bc   : > { %s820_s10 = smov %s582_s11  ;;  %s821_s11 = smov %s644_s18 }
 0x3bd   : > { %s822_s12 = smov %s632_s15  ;;  %17 = sbr.rel (!%p15_p4) target bundleno = 5 (0x5), region = 73 }
 0x3c4   :  { %366 = vsyncpa [#allocation3], 1 }
 0x3c5   :  { %368 = vsyncpa [#allocation3 + $0x1], 1 }
 0x3c6   :  { %369 = vsyncpa [#allocation4], 1 }
 0x3c7   :  { %371 = vsyncpa [#allocation4 + $0x1], 1 }

</bundles_post_ra>
